<compile_context>
chip_gen: v7x
topology: tpu7x:2x2x1
jax: 0.10.0
libtpu: 0.0.40
codegen_flags: <defaults>
</compile_context>

<pallas_src>
import jax
import jax.numpy as jnp
import numpy as np
from jax.experimental import pallas as pl
from jax.experimental.pallas import tpu as pltpu

HV, HA = 32, 64          # hidden sizes of the value / advantage branches
H = HV + HA              # fused hidden width = 96


def _round_up(x, m):
    return (x + m - 1) // m * m


# ----------------------------------------------------------------------------
# Parameter packing: ONE padded slab, every section on an 8-row boundary.
#
# Row layout (width = H = 96 lanes):
#   [0, S_pad)            : W1 = [W1v | W1a]           (zero rows pad S -> S_pad)
#   [S_pad, S_pad+8)      : row 0 = b1 = [b1v | b1a],   rows 1..7 zero
#   [S_pad+8, S_pad+8+H)  : W2 block-diagonal, ADV-first columns:
#                             rows 0..31  (h_value rows) -> column A      (V)
#                             rows 32..95 (h_adv rows)   -> columns 0..A-1 (ADV)
#   last 8 rows           : row 0 = b2 = [b2a | b2v],   rows 1..7 zero
# ----------------------------------------------------------------------------
def pack_params(params, dtype=jnp.float32):
    w1v, b1v = params["w1v"], params["b1v"]   # (S,32), (1,32)
    w1a, b1a = params["w1a"], params["b1a"]   # (S,64), (1,64)
    w2v, b2v = params["w2v"], params["b2v"]   # (32,1), (1,1)
    w2a, b2a = params["w2a"], params["b2a"]   # (64,A), (1,A)

    S = w1v.shape[0]
    A = w2a.shape[1]
    assert A + 1 <= H, "action_size+1 must fit in the 96-wide slab"
    S_pad = _round_up(max(S, 1), 8)

    slab = jnp.zeros((S_pad + 8 + H + 8, H), jnp.float32)
    # layer 1: weights + bias row
    slab = slab.at[:S, :HV].set(w1v)
    slab = slab.at[:S, HV:].set(w1a)
    slab = slab.at[S_pad, :HV].set(b1v[0])
    slab = slab.at[S_pad, HV:].set(b1a[0])
    # layer 2: block-diagonal weights (ADV cols first, V col last) + bias row
    r2 = S_pad + 8
    slab = slab.at[r2:r2 + HV, A:A + 1].set(w2v)
    slab = slab.at[r2 + HV:r2 + H, :A].set(w2a)
    slab = slab.at[r2 + H, :A].set(b2a[0])
    slab = slab.at[r2 + H, A].set(b2v[0, 0])
    return slab.astype(dtype)


def _unpack(slab_ref, s_pad):
    """Slice the slab ref into W1/b1/W2/b2 views (all 8-row aligned)."""
    h = slab_ref.shape[0] - s_pad - 16
    r2 = s_pad + 8
    w1 = slab_ref[:s_pad, :]
    b1 = slab_ref[s_pad:s_pad + 1, :]
    w2 = slab_ref[r2:r2 + h, :]
    b2 = slab_ref[r2 + h:r2 + h + 1, :]
    return w1, b1, w2, b2


# ----------------------------------------------------------------------------
# Kernels
# ----------------------------------------------------------------------------
def _dueling_q_fused_kernel(state_ref, slab_ref, out_ref):
    """Grid-less, fully fused path: whole batch resident, in-kernel global mean."""
    x = state_ref[...]                                   # (B, S_pad)
    a = out_ref.shape[1]
    w1, b1, w2, b2 = _unpack(slab_ref, x.shape[1])

    hid = jnp.maximum(jnp.dot(x, w1, preferred_element_type=jnp.float32) + b1, 0.0)
    y = jnp.dot(hid, w2, preferred_element_type=jnp.float32) + b2   # (B, H)

    adv = y[:, :a]                                       # lane-aligned prefix
    v = y[:, a:a + 1]
    out_ref[...] = (v + adv - jnp.mean(adv)).astype(out_ref.dtype)


def _dueling_q_tiled_kernel(state_ref, slab_ref, qpre_ref, rowsum_ref):
    """Batch-tiled path: emit q_pre = v + adv and per-row adv sums (phase 1)."""
    x = state_ref[...]                                   # (TB, S_pad)
    a = qpre_ref.shape[1]
    w1, b1, w2, b2 = _unpack(slab_ref, x.shape[1])

    hid = jnp.maximum(jnp.dot(x, w1, preferred_element_type=jnp.float32) + b1, 0.0)
    y = jnp.dot(hid, w2, preferred_element_type=jnp.float32) + b2   # (TB, H)

    adv = y[:, :a]
    v = y[:, a:a + 1]
    qpre_ref[...] = (v + adv).astype(qpre_ref.dtype)
    rowsum_ref[...] = jnp.sum(adv, axis=1, keepdims=True)


# ----------------------------------------------------------------------------
# Wrapper
# ----------------------------------------------------------------------------
def dueling_q_forward(state, slab, action_size, *, batch_tile=2048):
    """state: (B, S) f32; slab: packed params from pack_params(); returns (B, A)."""
    B, S = state.shape
    A = action_size
    S_pad = slab.shape[0] - H - 16
    assert S <= S_pad
    if S != S_pad:
        state = jnp.pad(state, ((0, 0), (0, S_pad - S)))   # zero features: exact
    state = state.astype(slab.dtype)

    if B <= batch_tile:
        # Small/medium B: grid-less fused call (2 input DMAs, global mean in-kernel).
        flops = 2 * B * S_pad * H + 2 * B * H * H + 8 * B * (H + A)
        bytes_accessed = 4 * (B * S_pad + int(slab.size) + B * A)
        return pl.pallas_call(
            _dueling_q_fused_kernel,
            out_shape=jax.ShapeDtypeStruct((B, A), jnp.float32),
            in_specs=[pl.BlockSpec(memory_space=pltpu.MemorySpace.VMEM)] * 2,
            out_specs=pl.BlockSpec(memory_space=pltpu.MemorySpace.VMEM),
            cost_estimate=pl.CostEstimate(
                flops=flops, transcendentals=0, bytes_accessed=bytes_accessed),
        )(state, slab)

    # Large B: batch grid, resident weight slab, "parallel" batch axis (v7x
    # megacore), two-phase global mean (partial row-sums + tiny XLA epilogue).
    TB = batch_tile
    B_pad = _round_up(B, TB)
    if B_pad != B:
        state = jnp.pad(state, ((0, B_pad - B), (0, 0)))
    q_pre, rowsum = pl.pallas_call(
        _dueling_q_tiled_kernel,
        out_shape=(jax.ShapeDtypeStruct((B_pad, A), jnp.float32),
                   jax.ShapeDtypeStruct((B_pad, 1), jnp.float32)),
        grid=(B_pad // TB,),
        in_specs=[pl.BlockSpec((TB, S_pad), lambda i: (i, 0)),
                  pl.BlockSpec(slab.shape, lambda i: (0, 0))],
        out_specs=(pl.BlockSpec((TB, A), lambda i: (i, 0)),
                   pl.BlockSpec((TB, 1), lambda i: (i, 0))),
        compiler_params=pltpu.CompilerParams(dimension_semantics=("parallel",)),
    )(state, slab)
    adv_mean = jnp.sum(rowsum[:B]) / (B * A)     # padded rows excluded -> exact
    return q_pre[:B] - adv_mean


# ----------------------------------------------------------------------------
# Init + reference (mirrors torch.nn.Linear default init, weights as (in, out))
# ----------------------------------------------------------------------------
def init_params(key, state_size, action_size):
    def linear(key, fan_in, fan_out):
        kw, kb = jax.random.split(key)
        bound = 1.0 / np.sqrt(fan_in)
        w = jax.random.uniform(kw, (fan_in, fan_out), jnp.float32, -bound, bound)
        b = jax.random.uniform(kb, (1, fan_out), jnp.float32, -bound, bound)
        return w, b

    k1, k2, k3, k4 = jax.random.split(key, 4)
    w1v, b1v = linear(k1, state_size, HV)
    w2v, b2v = linear(k2, HV, 1)
    w1a, b1a = linear(k3, state_size, HA)
    w2a, b2a = linear(k4, HA, action_size)
    return dict(w1v=w1v, b1v=b1v, w2v=w2v, b2v=b2v,
                w1a=w1a, b1a=b1a, w2a=w2a, b2a=b2a)


def reference_forward(state, p):
    xv = jax.nn.relu(state @ p["w1v"] + p["b1v"])
    v = xv @ p["w2v"] + p["b2v"]
    xa = jax.nn.relu(state @ p["w1a"] + p["b1a"])
    adv = xa @ p["w2a"] + p["b2a"]
    return v + adv - jnp.mean(adv)


if __name__ == "__main__":
    # LunarLander-like sizes: state_size=8, action_size=4, small batch.
    state_size, action_size, batch = 8, 4, 2

    key = jax.random.PRNGKey(0)
    k_params, k_state, k_big = jax.random.split(key, 3)
    params = init_params(k_params, state_size, action_size)
    slab = pack_params(params)            # pack once, reuse for every forward

    # --- small-batch fused path (the LunarLander regime) ---
    state = jax.random.normal(k_state, (batch, state_size), dtype=jnp.float32)
    out = jax.block_until_ready(dueling_q_forward(state, slab, action_size))
    ref = reference_forward(state, params)
    np.testing.assert_allclose(np.asarray(out), np.asarray(ref), rtol=1e-5, atol=1e-5)

    # --- batch-tiled path (two-phase global mean, padded batch, parallel axis) ---
    big_state = jax.random.normal(k_big, (320, state_size), dtype=jnp.float32)
    out_big = jax.block_until_ready(
        dueling_q_forward(big_state, slab, action_size, batch_tile=128))
    ref_big = reference_forward(big_state, params)
    np.testing.assert_allclose(np.asarray(out_big), np.asarray(ref_big),
                               rtol=1e-5, atol=1e-5)

    print("KERNEL_OK")
</pallas_src>

<mosaic_0001>
module attributes {stable_mosaic.version = 11 : i64} {
  func.func @_dueling_q_fused_kernel(%arg0: memref<2x8xf32, #tpu.memory_space<vmem>>, %arg1: memref<120x96xf32, #tpu.memory_space<vmem>>, %arg2: memref<2x4xf32, #tpu.memory_space<vmem>>) attributes {dimension_semantics = [], scalar_prefetch = 0 : i64, scratch_operands = 0 : i64, tpu.core_type = #tpu.core_type<tc>} {
    %c0 = arith.constant 0 : index
    %c0_0 = arith.constant 0 : index
    %0 = vector.load %arg0[%c0, %c0_0] : memref<2x8xf32, #tpu.memory_space<vmem>>, vector<2x8xf32>
    %c0_1 = arith.constant 0 : index
    %c0_2 = arith.constant 0 : index
    %1 = vector.load %arg1[%c0_1, %c0_2] : memref<120x96xf32, #tpu.memory_space<vmem>>, vector<8x96xf32>
    %c8 = arith.constant 8 : index
    %c0_3 = arith.constant 0 : index
    %2 = vector.load %arg1[%c8, %c0_3] : memref<120x96xf32, #tpu.memory_space<vmem>>, vector<1x96xf32>
    %c16 = arith.constant 16 : index
    %c0_4 = arith.constant 0 : index
    %3 = vector.load %arg1[%c16, %c0_4] : memref<120x96xf32, #tpu.memory_space<vmem>>, vector<96x96xf32>
    %c112 = arith.constant 112 : index
    %c0_5 = arith.constant 0 : index
    %4 = vector.load %arg1[%c112, %c0_5] : memref<120x96xf32, #tpu.memory_space<vmem>>, vector<1x96xf32>
    %cst = arith.constant dense<0.000000e+00> : vector<2x96xf32>
    %5 = tpu.matmul %0, %1, %cst {dimension_numbers = #tpu.dot_dimension_numbers<[1], [0], [0], [1], [0, 0, 1, 1], [], []>} : vector<2x8xf32>, vector<8x96xf32>, vector<2x96xf32> -> vector<2x96xf32>
    %6 = vector.broadcast %2 : vector<1x96xf32> to vector<2x96xf32>
    %7 = arith.addf %5, %6 : vector<2x96xf32>
    %cst_6 = arith.constant 0.000000e+00 : f32
    %8 = vector.broadcast %cst_6 : f32 to vector<2x96xf32>
    %9 = arith.maximumf %7, %8 : vector<2x96xf32>
    %cst_7 = arith.constant dense<0.000000e+00> : vector<2x96xf32>
    %10 = tpu.matmul %9, %3, %cst_7 {dimension_numbers = #tpu.dot_dimension_numbers<[1], [0], [0], [1], [0, 0, 1, 1], [], []>} : vector<2x96xf32>, vector<96x96xf32>, vector<2x96xf32> -> vector<2x96xf32>
    %11 = vector.broadcast %4 : vector<1x96xf32> to vector<2x96xf32>
    %12 = arith.addf %10, %11 : vector<2x96xf32>
    %13 = vector.extract_strided_slice %12 {offsets = [0, 0], sizes = [2, 4], strides = [1, 1]} : vector<2x96xf32> to vector<2x4xf32>
    %14 = vector.extract_strided_slice %12 {offsets = [0, 4], sizes = [2, 1], strides = [1, 1]} : vector<2x96xf32> to vector<2x1xf32>
    %15 = vector.broadcast %14 : vector<2x1xf32> to vector<2x4xf32>
    %16 = arith.addf %15, %13 : vector<2x4xf32>
    %17 = vector.shape_cast %13 : vector<2x4xf32> to vector<1x2x4xf32>
    %cst_8 = arith.constant dense<0.000000e+00> : vector<1xf32>
    %18 = vector.multi_reduction <add>, %17, %cst_8 [1, 2] : vector<1x2x4xf32> to vector<1xf32>
    %19 = vector.shape_cast %18 : vector<1xf32> to vector<1x1x1xf32>
    %20 = vector.extract %19[0, 0, 0] : f32 from vector<1x1x1xf32>
    %cst_9 = arith.constant 8.000000e+00 : f32
    %21 = arith.divf %20, %cst_9 : f32
    %22 = vector.broadcast %21 : f32 to vector<2x4xf32>
    %23 = arith.subf %16, %22 : vector<2x4xf32>
    %c0_10 = arith.constant 0 : index
    %c0_11 = arith.constant 0 : index
    %24 = vector.load %arg2[%c0_10, %c0_11] : memref<2x4xf32, #tpu.memory_space<vmem>>, vector<2x4xf32>
    tpu.vector_store %arg2[%c0_10, %c0_11], %23 {strides = array<i32>} : memref<2x4xf32, #tpu.memory_space<vmem>>, vector<2x4xf32>,
    return
  }
}

</mosaic_0001>

<bundles_post_ra>
// kernel: tpu_custom_call.1
= control target key start
LH: loop header
LB: loop body
LE: loop exit
PB: predicated region body
PF: predicated region fallthrough
CT: control target
= control target key end

     0   :  { %vm32_vm0 = vcmask 64512   ;;  %v323_v2 = vmov 0.0   ;;  %vm324_vm1 = vmmov 0   ;;  %v325_v6 = vmov 0.0|0.0   ;;  %s405_s0 = inlined_call_operand.vmem [shape: f32[2,8], index: 0, kind: input, shape index: {}]   ;;  %s406_s1 = inlined_call_operand.vmem [shape: f32[120,96], index: 1, kind: input, shape index: {}]   ;;  %s407_s2 = inlined_call_operand.hbm [shape: f32[2,4], index: 2, kind: output, shape index: {}]  }
   0x1   :  { %v13_v0 = vld [vmem:[%s406_s1] sm:$0xff]  ;;  %241 = vmatprep.subr.mxu0 %v323_v2  ;;  %243 = vmatprep.mubr.msk.f32.mxu0 %vm324_vm1, %v323_v2  ;;  %v15_v3 = vld [vmem:[%s406_s1 + $0x10] sm:$0xff]  ;;  %v16_v4 = vld [vmem:[%s406_s1 + $0x18] sm:$0xff] }
   0x2   :  { %v12_v1 = vld [vmem:[%s405_s0] sm:$0x3]  ;;  %242 = vmatpush3.msra.mxu0 %v13_v0  ;;  %273 = vmatprep.subr.bf16.mxu1 %v325_v6  ;;  %v274_v7 = vpack.c.bf16 %v16_v4, %v15_v3  ;;  %v18_v8 = vld [vmem:[%s406_s1 + $0x28] sm:$0xff] }
   0x3   :  { %v17_v5 = vld [vmem:[%s406_s1 + $0x20] sm:$0xff]  ;;  %244 = vmatmul.mubr.msk.f32.vlgmr.msra.gmra.mrb[0].mxu0 %vm32_vm0, %v12_v1  ;;  %270 = vmatprep.mubr.msk.f32.mxu1 %vm324_vm1, %v323_v2 }
   0x4   :  { %275 = vmatpush3.bf16.msra.mxu1 %v274_v7  ;;  %v277_v9 = vpack.c.bf16 %v18_v8, %v17_v5 }
   0x5   :  { %7 = vsyncpa [#allocation3], 0  ;;  %276 = vmatprep.subr.bf16.mxu1 %v325_v6  ;;  %v19_v10 = vld [vmem:[%s406_s1 + $0x30] sm:$0xff]  ;;  %v20_v11 = vld [vmem:[%s406_s1 + $0x38] sm:$0xff]  ;;  %vm111_vm2 = vcmask 785408   ;;  %v326_v27 = vmov 4  }
   0x6   :  { %v280_v12 = vpack.c.bf16 %v20_v11, %v19_v10  ;;  %v21_v13 = vld [vmem:[%s406_s1 + $0x40] sm:$0xff]  ;;  %v22_v14 = vld [vmem:[%s406_s1 + $0x48] sm:$0xff]  ;;  %v23_v16 = vld [vmem:[%s406_s1 + $0x50] sm:$0xff]  ;;  %298 = vset.pattern.permute.xlu0 %v326_v27  ;;  %vm191_vm3 = vcmask 25600  }
   0x7   :  { %v283_v15 = vpack.c.bf16 %v22_v14, %v21_v13  ;;  %v24_v17 = vld [vmem:[%s406_s1 + $0x58] sm:$0xff]  ;;  %v25_v19 = vld [vmem:[%s406_s1 + $0x60] sm:$0xff]  ;;  %v26_v20 = vld [vmem:[%s406_s1 + $0x68] sm:$0xff] }
   0x8   :  { %278 = vmatpush3.bf16.msra.mxu1 %v277_v9  ;;  %v286_v18 = vpack.c.bf16 %v24_v17, %v23_v16  ;;  %v289_v21 = vpack.c.bf16 %v26_v20, %v25_v19  ;;  %v222_v22 = vld [vmem:[%s406_s1 + $0x8] ss:$0 sm:$0xff]  ;;  %v224_v28 = vld [vmem:[%s406_s1 + $0x70] ss:$0 sm:$0xff]  ;;  %s327_s1 = smov [#allocation2]  }
   0x9   :  { %279 = vmatprep.subr.bf16.mxu1 %v325_v6  ;;  %s214_s14 = sshll.u32 %s327_s1, 4  ;;  %s215_s14 = int_to_ptr.vmem [resolvable:$true] %s214_s14 }
   0xa   :  { %s299_s15 = scalar_lea.vmem %s215_s14, 32  ;;  %p304_p1 = scmp.lt.s32.totalorder %s215_s14, %s215_s14 }
   0xb   :  { %p300_p0 = scmp.ne.s32.totalorder %s215_s14, %s299_s15  ;;  %p305_p2 = scmp.lt.s32.totalorder %s299_s15, %s299_s15 }
   0xc   :  { %281 = vmatpush3.bf16.msra.mxu1 %v280_v12 }
   0xd   :  { %282 = vmatprep.subr.bf16.mxu1 %v325_v6  ;;  %p306_p3 = por %p305_p2, %p304_p1 }
   0xf   :  { %p307_p4 = pnand %p306_p3, %p300_p0 }
  0x10   :  { %284 = vmatpush3.bf16.msra.mxu1 %v283_v15 }
  0x11   :  { %285 = vmatprep.subr.bf16.mxu1 %v325_v6 }
  0x14   :  { %287 = vmatpush3.bf16.msra.mxu1 %v286_v18 }
  0x15   :  { %288 = vmatprep.subr.bf16.mxu1 %v325_v6 }
  0x18   :  { %290 = vmatpush3.bf16.msra.mxu1 %v289_v21 }
  0xd6   :  { %v102_v23 = vpop.f32.mrb[0].mxu0 }
  0xd7   :  { %v103_v24 = vadd.f32 %v222_v22, %v102_v23  ;;  %v245_v25 = vpop.f32.mrb[1].mxu0 }
  0xd9   :  { %v106_v26 = vmax.f32 %v103_v24, 0.0 }
  0xdb   :  { %271 = vmatmul.mubr.msk.f32.vlgmr.msra.gmra.mrb[0].mxu1 %vm111_vm2, %v106_v26 }
 0x1ae   :  { %v181_v29 = vpop.f32.mrb[0].mxu1 }
 0x1af   :  { %v182_v30 = vadd.f32 %v224_v28, %v181_v29  ;;  %v272_v31 = vpop.f32.mrb[1].mxu1 }
 0x1b1   :  { %v192_v32 = vsel %vm191_vm3, %v182_v30, 0.0 }
 0x1b2   :  { %193 = vadd.xlane.f32.xlu0 %v192_v32 }
 0x1c8   :  { %187 = vperm.xlu0 %298, %v182_v30  }
 0x23f   :  { %v194_v33 = vpop.xlane.xlu0 %193 }
 0x240   :  { %v195_v34 = vrot.slane %v194_v33, 4 }
 0x242   :  { %v196_v35 = vadd.f32 %v195_v34, %v194_v33 }
 0x244   :  { %v197_v36 = vrot.slane %v196_v35, 2 }
 0x246   :  { %v198_v37 = vadd.f32 %v197_v36, %v196_v35 }
 0x247   :  { %v188_v40 = vpop.permute.xlu0 %187 }
 0x248   :  { %v199_v38 = vrot.slane %v198_v37, 1  ;;  %v190_v41 = vadd.f32 %v188_v40, %v182_v30 }
 0x24a   :  { %v200_v39 = vadd.f32 %v199_v38, %v198_v37 }
 0x24c   :  { %291 = vpush %v200_v39 }
 0x27d   :  { %s292_s12 = spop %291 }
 0x27e   :  { %s204_s13 = smul.f32 0.125, %s292_s12 }
 0x280   :  { %v205_v42 = vstv %s204_s13 }
 0x281   :  { %v206_v43 = vsub.f32 %v190_v41, %v205_v42 }
 0x283   :  { %207 = vst.msk [vmem:[#allocation2] sm:$0x3] %vm191_vm3, %v206_v43 }
 0x284   :  { %310 = shalt.err (!%p307_p4)
}
 0x285   :  { %s311_s18 = scalar_lea.hbm %s407_s2, 32 }
 0x286   :  { %p312_p5 = scmp.ne.s32.totalorder %s407_s2, %s311_s18  ;;  %p315_p6 = scmp.lt.u32.totalorder %s311_s18, %s407_s2 }
 0x288   :  { %p317_p7 = pnand %p315_p6, %p312_p5 }
 0x28a   :  { %320 = shalt.err (!%p317_p7)
}
 0x28b   :  { %217 = dma.vmem_to_hbm [thread:$0]  %s215_s14, 32, %s407_s2, [#allocation3]  }
 0x28c   :  { %321 = dma.done.wait [#allocation3], 32  }
 0x28d   :  { %322 = vsyncadd [#allocation3], 4294967264 }
 0x28e   :  { %221 = vsyncpa [#allocation3], 1 }

</bundles_post_ra>
